<compile_context>
chip_gen: v7x
topology: tpu7x:2x2x1
jax: 0.10.0
libtpu: 0.0.40
codegen_flags: <defaults>
</compile_context>

<pallas_src>
import functools

import jax
import jax.numpy as jnp
from jax.experimental import pallas as pl
from jax.experimental.pallas import tpu as pltpu

BN_EPS = 1e-5
LANE = 128      # TPU lane width: pad feature dims to multiples of this.
SUBLANE = 8     # TPU sublane count: pad the batch dim to multiples of this.


# ----------------------------- helpers -------------------------------------

def _round_up(n, m):
    return ((n + m - 1) // m) * m


def _pad2(a, rows, cols):
    r, c = a.shape
    return jnp.pad(a, ((0, rows - r), (0, cols - c)))


def _full_spec(shape):
    # Whole-array block (block shape equals full array dims -> satisfies TPU
    # tiling rules); the kernel runs as a single grid step.
    return pl.BlockSpec(shape, lambda: tuple(0 for _ in shape))


# ----------------------------- fused kernel --------------------------------

def make_fused_mlp_kernel(n_layers, batch_real, batch_pad):
    """Fused MLP kernel.

    Ref layout (positional):
      x_ref,
      (w_ref, b_ref, gamma_ref, beta_ref)  for each hidden layer,
      (w_ref, b_ref)                       for the final layer,
      o_ref
    x/w are bf16 (lane-padded); b/gamma/beta/out are f32.
    """
    need_mask = batch_pad > batch_real
    inv_b = 1.0 / float(batch_real)

    def kernel(*refs):
        x_ref = refs[0]
        o_ref = refs[-1]
        h = x_ref[...]  # (Bp, D0p) bf16, stays resident on-chip
        if need_mask:
            # Rows >= batch_real are zero-padding; keep them out of BN stats.
            row_mask = (
                jax.lax.broadcasted_iota(jnp.int32, (batch_pad, 1), 0)
                < batch_real
            )
        idx = 1
        for i in range(n_layers):
            last = i == n_layers - 1
            if not last:
                w_ref, b_ref, g_ref, bt_ref = refs[idx:idx + 4]
                idx += 4
            else:
                w_ref, b_ref = refs[idx:idx + 2]
                idx += 2

            # bf16 x bf16 matmul on the MXU with f32 accumulation.
            y = jnp.dot(h, w_ref[...], preferred_element_type=jnp.float32)
            y = y + b_ref[...]  # (1, Dp) broadcast, hoisted (once per layer)

            if not last:
                # BatchNorm1d (training mode): per-batch mean, biased variance.
                if need_mask:
                    y = jnp.where(row_mask, y, 0.0)
                    mean = jnp.sum(y, axis=0, keepdims=True) * inv_b
                    diff = jnp.where(row_mask, y - mean, 0.0)
                    var = jnp.sum(diff * diff, axis=0, keepdims=True) * inv_b
                else:
                    mean = jnp.mean(y, axis=0, keepdims=True)
                    diff = y - mean
                    var = jnp.mean(diff * diff, axis=0, keepdims=True)
                y = diff * jax.lax.rsqrt(var + BN_EPS)        # EUP
                y = y * g_ref[...] + bt_ref[...]
                y = jnp.maximum(y, 0.0)                       # ReLU
                h = y.astype(jnp.bfloat16)                    # back to MXU dtype
            else:
                o_ref[...] = y.astype(o_ref.dtype)            # lane-dense store

    return kernel


def fused_mlp_forward(x_pad, *flat_inputs, n_layers, batch_real, out_dim_pad):
    """One pallas_call for the whole network."""
    batch_pad = x_pad.shape[0]
    operands = (x_pad,) + tuple(flat_inputs)
    return pl.pallas_call(
        make_fused_mlp_kernel(n_layers, batch_real, batch_pad),
        out_shape=jax.ShapeDtypeStruct((batch_pad, out_dim_pad), jnp.float32),
        in_specs=[_full_spec(a.shape) for a in operands],
        out_specs=_full_spec((batch_pad, out_dim_pad)),
        compiler_params=pltpu.CompilerParams(vmem_limit_bytes=64 * 1024 * 1024),
    )(*operands)


# ----------------------------- parameter init ------------------------------

def init_mlp_params(num_nodes, seed=0):
    """Mirrors nn.Linear defaults (uniform(-1/sqrt(fan_in), +1/sqrt(fan_in)))
    and nn.BatchNorm1d defaults (gamma=1, beta=0).  Stored unpadded, f32,
    weights transposed to (in_features, out_features)."""
    key = jax.random.PRNGKey(seed)
    params = []
    n_layers = len(num_nodes) - 1
    for i in range(n_layers):
        fan_in, fan_out = num_nodes[i], num_nodes[i + 1]
        key, kw, kb = jax.random.split(key, 3)
        bound = 1.0 / jnp.sqrt(jnp.float32(fan_in))
        w_t = jax.random.uniform(kw, (fan_in, fan_out), jnp.float32, -bound, bound)
        b = jax.random.uniform(kb, (1, fan_out), jnp.float32, -bound, bound)
        params.append(dict(
            w_t=w_t, b=b,
            gamma=jnp.ones((1, fan_out), jnp.float32),
            beta=jnp.zeros((1, fan_out), jnp.float32),
            has_bn_act=(i < n_layers - 1),   # activate_output=False pops final BN+act
        ))
    return params


def pack_kernel_inputs(params):
    """Zero-pad feature dims to 128 lanes; weights to bf16, vectors stay f32."""
    flat = []
    n_layers = len(params)
    for i, p in enumerate(params):
        d_in, d_out = p["w_t"].shape
        dpi, dpo = _round_up(d_in, LANE), _round_up(d_out, LANE)
        flat.append(_pad2(p["w_t"], dpi, dpo).astype(jnp.bfloat16))
        flat.append(_pad2(p["b"], 1, dpo))
        if i < n_layers - 1:
            flat.append(_pad2(p["gamma"], 1, dpo))
            flat.append(_pad2(p["beta"], 1, dpo))
    return flat


# ----------------------------- reference (plain JAX) ------------------------

def mlp_reference(x, params):
    """Same math and same bf16 rounding points as the kernel, in plain JAX."""
    h = x
    for p in params:
        hm = h.astype(jnp.bfloat16).astype(jnp.float32)
        w = p["w_t"].astype(jnp.bfloat16).astype(jnp.float32)
        y = hm @ w + p["b"]
        if p["has_bn_act"]:
            mean = jnp.mean(y, axis=0, keepdims=True)
            var = jnp.mean((y - mean) ** 2, axis=0, keepdims=True)
            y = (y - mean) * jax.lax.rsqrt(var + BN_EPS)
            y = y * p["gamma"] + p["beta"]
            y = jnp.maximum(y, 0.0)
        h = y
    return h


# ----------------------------- main -----------------------------------------

if __name__ == "__main__":
    # Small MLP: num_nodes = [16, 32, 32, 8], batch = 8
    num_nodes = [16, 32, 32, 8]
    batch = 8
    n_layers = len(num_nodes) - 1

    params = init_mlp_params(num_nodes, seed=0)
    x = jax.random.normal(jax.random.PRNGKey(0), (batch, num_nodes[0]), jnp.float32)

    # Pad: batch to a sublane multiple, features to lane multiples.
    b_pad = _round_up(batch, SUBLANE)
    d0_pad = _round_up(num_nodes[0], LANE)
    dl_pad = _round_up(num_nodes[-1], LANE)
    x_pad = jnp.pad(
        x, ((0, b_pad - batch), (0, d0_pad - num_nodes[0]))
    ).astype(jnp.bfloat16)
    flat = pack_kernel_inputs(params)

    fwd = jax.jit(functools.partial(
        fused_mlp_forward, n_layers=n_layers, batch_real=batch,
        out_dim_pad=dl_pad))

    out_pad = fwd(x_pad, *flat)
    out_pad = jax.block_until_ready(out_pad)
    out = out_pad[:batch, :num_nodes[-1]]      # slice real rows / output columns

    ref = mlp_reference(x, params)
    assert out.shape == (batch, num_nodes[-1])
    assert jnp.allclose(out, ref, atol=1e-4, rtol=1e-4), "mismatch vs reference"

    print("KERNEL_OK")
</pallas_src>

<mosaic_0001>
module attributes {stable_mosaic.version = 11 : i64} {
  func.func @kernel(%arg0: memref<8x128xbf16, #tpu.memory_space<vmem>>, %arg1: memref<128x128xbf16, #tpu.memory_space<vmem>>, %arg2: memref<1x128xf32, #tpu.memory_space<vmem>>, %arg3: memref<1x128xf32, #tpu.memory_space<vmem>>, %arg4: memref<1x128xf32, #tpu.memory_space<vmem>>, %arg5: memref<128x128xbf16, #tpu.memory_space<vmem>>, %arg6: memref<1x128xf32, #tpu.memory_space<vmem>>, %arg7: memref<1x128xf32, #tpu.memory_space<vmem>>, %arg8: memref<1x128xf32, #tpu.memory_space<vmem>>, %arg9: memref<128x128xbf16, #tpu.memory_space<vmem>>, %arg10: memref<1x128xf32, #tpu.memory_space<vmem>>, %arg11: memref<8x128xf32, #tpu.memory_space<vmem>>) attributes {dimension_semantics = [], scalar_prefetch = 0 : i64, scratch_operands = 0 : i64, tpu.core_type = #tpu.core_type<tc>} {
    %c0 = arith.constant 0 : index
    %c0_0 = arith.constant 0 : index
    %0 = vector.load %arg0[%c0, %c0_0] : memref<8x128xbf16, #tpu.memory_space<vmem>>, vector<8x128xbf16>
    %c0_1 = arith.constant 0 : index
    %c0_2 = arith.constant 0 : index
    %1 = vector.load %arg1[%c0_1, %c0_2] : memref<128x128xbf16, #tpu.memory_space<vmem>>, vector<128x128xbf16>
    %cst = arith.constant dense<0.000000e+00> : vector<8x128xf32>
    %2 = tpu.matmul %0, %1, %cst {dimension_numbers = #tpu.dot_dimension_numbers<[1], [0], [0], [1], [0, 0, 1, 1], [], []>} : vector<8x128xbf16>, vector<128x128xbf16>, vector<8x128xf32> -> vector<8x128xf32>
    %c0_3 = arith.constant 0 : index
    %c0_4 = arith.constant 0 : index
    %3 = vector.load %arg2[%c0_3, %c0_4] : memref<1x128xf32, #tpu.memory_space<vmem>>, vector<1x128xf32>
    %4 = vector.broadcast %3 : vector<1x128xf32> to vector<8x128xf32>
    %5 = arith.addf %2, %4 : vector<8x128xf32>
    %cst_5 = arith.constant dense<0.000000e+00> : vector<128xf32>
    %6 = vector.multi_reduction <add>, %5, %cst_5 [0] : vector<8x128xf32> to vector<128xf32>
    %7 = vector.shape_cast %6 : vector<128xf32> to vector<1x128xf32>
    %cst_6 = arith.constant 8.000000e+00 : f32
    %8 = vector.broadcast %cst_6 : f32 to vector<1x128xf32>
    %9 = arith.divf %7, %8 : vector<1x128xf32>
    %10 = vector.broadcast %9 : vector<1x128xf32> to vector<8x128xf32>
    %11 = arith.subf %5, %10 : vector<8x128xf32>
    %12 = arith.mulf %11, %11 : vector<8x128xf32>
    %cst_7 = arith.constant dense<0.000000e+00> : vector<128xf32>
    %13 = vector.multi_reduction <add>, %12, %cst_7 [0] : vector<8x128xf32> to vector<128xf32>
    %14 = vector.shape_cast %13 : vector<128xf32> to vector<1x128xf32>
    %cst_8 = arith.constant 8.000000e+00 : f32
    %15 = vector.broadcast %cst_8 : f32 to vector<1x128xf32>
    %16 = arith.divf %14, %15 : vector<1x128xf32>
    %cst_9 = arith.constant 9.99999974E-6 : f32
    %17 = vector.broadcast %cst_9 : f32 to vector<1x128xf32>
    %18 = arith.addf %16, %17 : vector<1x128xf32>
    %19 = math.rsqrt %18 : vector<1x128xf32>
    %20 = vector.broadcast %19 : vector<1x128xf32> to vector<8x128xf32>
    %21 = arith.mulf %11, %20 : vector<8x128xf32>
    %c0_10 = arith.constant 0 : index
    %c0_11 = arith.constant 0 : index
    %22 = vector.load %arg3[%c0_10, %c0_11] : memref<1x128xf32, #tpu.memory_space<vmem>>, vector<1x128xf32>
    %23 = vector.broadcast %22 : vector<1x128xf32> to vector<8x128xf32>
    %24 = arith.mulf %21, %23 : vector<8x128xf32>
    %c0_12 = arith.constant 0 : index
    %c0_13 = arith.constant 0 : index
    %25 = vector.load %arg4[%c0_12, %c0_13] : memref<1x128xf32, #tpu.memory_space<vmem>>, vector<1x128xf32>
    %26 = vector.broadcast %25 : vector<1x128xf32> to vector<8x128xf32>
    %27 = arith.addf %24, %26 : vector<8x128xf32>
    %cst_14 = arith.constant 0.000000e+00 : f32
    %28 = vector.broadcast %cst_14 : f32 to vector<8x128xf32>
    %29 = arith.maximumf %27, %28 : vector<8x128xf32>
    %30 = arith.truncf %29 : vector<8x128xf32> to vector<8x128xbf16>
    %c0_15 = arith.constant 0 : index
    %c0_16 = arith.constant 0 : index
    %31 = vector.load %arg5[%c0_15, %c0_16] : memref<128x128xbf16, #tpu.memory_space<vmem>>, vector<128x128xbf16>
    %cst_17 = arith.constant dense<0.000000e+00> : vector<8x128xf32>
    %32 = tpu.matmul %30, %31, %cst_17 {dimension_numbers = #tpu.dot_dimension_numbers<[1], [0], [0], [1], [0, 0, 1, 1], [], []>} : vector<8x128xbf16>, vector<128x128xbf16>, vector<8x128xf32> -> vector<8x128xf32>
    %c0_18 = arith.constant 0 : index
    %c0_19 = arith.constant 0 : index
    %33 = vector.load %arg6[%c0_18, %c0_19] : memref<1x128xf32, #tpu.memory_space<vmem>>, vector<1x128xf32>
    %34 = vector.broadcast %33 : vector<1x128xf32> to vector<8x128xf32>
    %35 = arith.addf %32, %34 : vector<8x128xf32>
    %cst_20 = arith.constant dense<0.000000e+00> : vector<128xf32>
    %36 = vector.multi_reduction <add>, %35, %cst_20 [0] : vector<8x128xf32> to vector<128xf32>
    %37 = vector.shape_cast %36 : vector<128xf32> to vector<1x128xf32>
    %cst_21 = arith.constant 8.000000e+00 : f32
    %38 = vector.broadcast %cst_21 : f32 to vector<1x128xf32>
    %39 = arith.divf %37, %38 : vector<1x128xf32>
    %40 = vector.broadcast %39 : vector<1x128xf32> to vector<8x128xf32>
    %41 = arith.subf %35, %40 : vector<8x128xf32>
    %42 = arith.mulf %41, %41 : vector<8x128xf32>
    %cst_22 = arith.constant dense<0.000000e+00> : vector<128xf32>
    %43 = vector.multi_reduction <add>, %42, %cst_22 [0] : vector<8x128xf32> to vector<128xf32>
    %44 = vector.shape_cast %43 : vector<128xf32> to vector<1x128xf32>
    %cst_23 = arith.constant 8.000000e+00 : f32
    %45 = vector.broadcast %cst_23 : f32 to vector<1x128xf32>
    %46 = arith.divf %44, %45 : vector<1x128xf32>
    %cst_24 = arith.constant 9.99999974E-6 : f32
    %47 = vector.broadcast %cst_24 : f32 to vector<1x128xf32>
    %48 = arith.addf %46, %47 : vector<1x128xf32>
    %49 = math.rsqrt %48 : vector<1x128xf32>
    %50 = vector.broadcast %49 : vector<1x128xf32> to vector<8x128xf32>
    %51 = arith.mulf %41, %50 : vector<8x128xf32>
    %c0_25 = arith.constant 0 : index
    %c0_26 = arith.constant 0 : index
    %52 = vector.load %arg7[%c0_25, %c0_26] : memref<1x128xf32, #tpu.memory_space<vmem>>, vector<1x128xf32>
    %53 = vector.broadcast %52 : vector<1x128xf32> to vector<8x128xf32>
    %54 = arith.mulf %51, %53 : vector<8x128xf32>
    %c0_27 = arith.constant 0 : index
    %c0_28 = arith.constant 0 : index
    %55 = vector.load %arg8[%c0_27, %c0_28] : memref<1x128xf32, #tpu.memory_space<vmem>>, vector<1x128xf32>
    %56 = vector.broadcast %55 : vector<1x128xf32> to vector<8x128xf32>
    %57 = arith.addf %54, %56 : vector<8x128xf32>
    %cst_29 = arith.constant 0.000000e+00 : f32
    %58 = vector.broadcast %cst_29 : f32 to vector<8x128xf32>
    %59 = arith.maximumf %57, %58 : vector<8x128xf32>
    %60 = arith.truncf %59 : vector<8x128xf32> to vector<8x128xbf16>
    %c0_30 = arith.constant 0 : index
    %c0_31 = arith.constant 0 : index
    %61 = vector.load %arg9[%c0_30, %c0_31] : memref<128x128xbf16, #tpu.memory_space<vmem>>, vector<128x128xbf16>
    %cst_32 = arith.constant dense<0.000000e+00> : vector<8x128xf32>
    %62 = tpu.matmul %60, %61, %cst_32 {dimension_numbers = #tpu.dot_dimension_numbers<[1], [0], [0], [1], [0, 0, 1, 1], [], []>} : vector<8x128xbf16>, vector<128x128xbf16>, vector<8x128xf32> -> vector<8x128xf32>
    %c0_33 = arith.constant 0 : index
    %c0_34 = arith.constant 0 : index
    %63 = vector.load %arg10[%c0_33, %c0_34] : memref<1x128xf32, #tpu.memory_space<vmem>>, vector<1x128xf32>
    %64 = vector.broadcast %63 : vector<1x128xf32> to vector<8x128xf32>
    %65 = arith.addf %62, %64 : vector<8x128xf32>
    %c0_35 = arith.constant 0 : index
    %c0_36 = arith.constant 0 : index
    %66 = vector.load %arg11[%c0_35, %c0_36] : memref<8x128xf32, #tpu.memory_space<vmem>>, vector<8x128xf32>
    tpu.vector_store %arg11[%c0_35, %c0_36], %65 {strides = array<i32>} : memref<8x128xf32, #tpu.memory_space<vmem>>, vector<8x128xf32>,
    return
  }
}

</mosaic_0001>

<bundles_post_ra>
// kernel: fused_mlp_forward.1
= control target key start
LH: loop header
LB: loop body
LE: loop exit
PB: predicated region body
PF: predicated region fallthrough
CT: control target
= control target key end

     0   :  { %16 = vsyncpa [#allocation3], 0  ;;  %s1302_s0 = inlined_call_operand.hbm [shape: bf16[8,128], index: 0, kind: input, shape index: {}]   ;;  %s1303_s1 = inlined_call_operand.hbm [shape: bf16[128,128], index: 1, kind: input, shape index: {}]   ;;  %s1304_s2 = inlined_call_operand.hbm [shape: f32[1,128], index: 2, kind: input, shape index: {}]   ;;  %s1305_s3 = inlined_call_operand.hbm [shape: f32[1,128], index: 3, kind: input, shape index: {}]   ;;  %s1306_s4 = inlined_call_operand.hbm [shape: f32[1,128], index: 4, kind: input, shape index: {}]   ;;  %s1307_s5 = inlined_call_operand.hbm [shape: bf16[128,128], index: 5, kind: input, shape index: {}]   ;;  %s1308_s6 = inlined_call_operand.hbm [shape: f32[1,128], index: 6, kind: input, shape index: {}]   ;;  %s1309_s7 = inlined_call_operand.hbm [shape: f32[1,128], index: 7, kind: input, shape index: {}]   ;;  %s1310_s8 = inlined_call_operand.hbm [shape: f32[1,128], index: 8, kind: input, shape index: {}]   ;;  %s1311_s9 = inlined_call_operand.hbm [shape: bf16[128,128], index: 9, kind: input, shape index: {}]   ;;  %s1312_s10 = inlined_call_operand.hbm [shape: f32[1,128], index: 10, kind: input, shape index: {}]   ;;  %s1313_s11 = inlined_call_operand.hbm [shape: f32[8,128], index: 11, kind: output, shape index: {}]  }
   0x1   :  { %17 = vsyncpa [#allocation6], 0 }
   0x2   :  { %18 = vsyncpa [#allocation9], 0 }
   0x3   :  { %19 = vsyncpa [#allocation12], 0 }
   0x4   :  { %20 = vsyncpa [#allocation15], 0 }
   0x5   :  { %21 = vsyncpa [#allocation18], 0 }
   0x6   :  { %22 = vsyncpa [#allocation4], 0  ;;  %s1043_s17 = smov [#allocation5]   ;;  %s765_s21 = scalar_lea.hbm %s1303_s1, 1024 }
   0x7   :  { %s38_s18 = sshll.u32 %s1043_s17, 4  ;;  %p766_p0 = scmp.ne.s32.totalorder %s1303_s1, %s765_s21  ;;  %s39_s18 = int_to_ptr.vmem [resolvable:$true] %s38_s18 }
   0x8   :  { %p769_p1 = scmp.lt.u32.totalorder %s765_s21, %s1303_s1 }
   0xa   :  { %p771_p2 = pnand %p769_p1, %p766_p0 }
   0xc   :  { %774 = shalt.err (!%p771_p2)
}
   0xd   :  { %s775_s26 = scalar_lea.vmem %s39_s18, 1024  ;;  %p780_p4 = scmp.lt.s32.totalorder %s39_s18, %s39_s18 }
   0xe   :  { %p776_p3 = scmp.ne.s32.totalorder %s39_s18, %s775_s26  ;;  %p781_p5 = scmp.lt.s32.totalorder %s775_s26, %s775_s26 }
  0x10   :  { %p782_p6 = por %p781_p5, %p780_p4 }
  0x12   :  { %p783_p7 = pnand %p782_p6, %p776_p3 }
  0x14   :  { %786 = shalt.err (!%p783_p7)
}
  0x15   :  { %s1044_s27 = smov 64   ;;  %s1045_s28 = smov 4  }
  0x16   :  { %44 = dma.hbm_to_vmem [thread:$0]  %s1303_s1, 1024, %s39_s18, [#allocation6], %s1044_s27, %s1044_s27, %s1045_s28  }
  0x17   :  { %s1046_s12 = smov [#allocation8]   ;;  %s1047_s14 = smov [#allocation11]  }
  0x18   :  { %s61_s13 = sshll.u32 %s1046_s12, 4  ;;  %s80_s15 = sshll.u32 %s1047_s14, 4  ;;  %s62_s13 = int_to_ptr.vmem [resolvable:$true] %s61_s13  ;;  %s81_s15 = int_to_ptr.vmem [resolvable:$true] %s80_s15 }
  0x19   :  { %s787_s19 = scalar_lea.hbm %s1305_s3, 16 }
  0x1a   :  { %p788_p8 = scmp.ne.s32.totalorder %s1305_s3, %s787_s19  ;;  %p791_p9 = scmp.lt.u32.totalorder %s787_s19, %s1305_s3 }
  0x1c   :  { %p793_p10 = pnand %p791_p9, %p788_p8 }
  0x1e   :  { %796 = shalt.err (!%p793_p10)
}
  0x1f   :  { %s797_s1 = scalar_lea.vmem %s62_s13, 16  ;;  %s801_s18 = scalar_lea.vmem %s62_s13, 32 }
  0x20   :  { %p798_p11 = scmp.ne.s32.totalorder %s62_s13, %s797_s1  ;;  %p802_p12 = scmp.lt.s32.totalorder %s62_s13, %s62_s13 }
  0x21   :  { %p803_p13 = scmp.lt.s32.totalorder %s801_s18, %s797_s1 }
  0x23   :  { %p804_p0 = por %p803_p13, %p802_p12 }
  0x25   :  { %p805_p1 = pnand %p804_p0, %p798_p11 }
  0x27   :  { %808 = shalt.err (!%p805_p1)
}
  0x28   :  { %64 = dma.hbm_to_vmem [thread:$0]  %s1305_s3, 16, %s62_s13, [#allocation9]  }
  0x29   :  { %s809_s30 = scalar_lea.hbm %s1307_s5, 1024 }
  0x2a   :  { %p810_p2 = scmp.ne.s32.totalorder %s1307_s5, %s809_s30  ;;  %p813_p3 = scmp.lt.u32.totalorder %s809_s30, %s1307_s5 }
  0x2c   :  { %p815_p4 = pnand %p813_p3, %p810_p2 }
  0x2e   :  { %818 = shalt.err (!%p815_p4)
}
  0x2f   :  { %s819_s19 = scalar_lea.vmem %s81_s15, 1024  ;;  %p824_p6 = scmp.lt.s32.totalorder %s81_s15, %s81_s15 }
  0x30   :  { %p820_p5 = scmp.ne.s32.totalorder %s81_s15, %s819_s19  ;;  %p825_p7 = scmp.lt.s32.totalorder %s819_s19, %s819_s19 }
  0x32   :  { %p826_p8 = por %p825_p7, %p824_p6 }
  0x34   :  { %p827_p9 = pnand %p826_p8, %p820_p5 }
  0x36   :  { %830 = shalt.err (!%p827_p9)
}
  0x37   :  { %86 = dma.hbm_to_vmem [thread:$0]  %s1307_s5, 1024, %s81_s15, [#allocation12], %s1044_s27, %s1044_s27, %s1045_s28  }
  0x38   :  { %s1048_s20 = smov [#allocation14]   ;;  %s1049_s22 = smov [#allocation17]  }
  0x39   :  { %s103_s21 = sshll.u32 %s1048_s20, 4  ;;  %s122_s23 = sshll.u32 %s1049_s22, 4  ;;  %s104_s21 = int_to_ptr.vmem [resolvable:$true] %s103_s21  ;;  %s123_s23 = int_to_ptr.vmem [resolvable:$true] %s122_s23 }
  0x3a   :  { %s831_s24 = scalar_lea.hbm %s1309_s7, 16 }
  0x3b   :  { %p832_p10 = scmp.ne.s32.totalorder %s1309_s7, %s831_s24  ;;  %p835_p11 = scmp.lt.u32.totalorder %s831_s24, %s1309_s7 }
  0x3d   :  { %p837_p12 = pnand %p835_p11, %p832_p10 }
  0x3f   :  { %840 = shalt.err (!%p837_p12)
}
  0x40   :  { %s841_s5 = scalar_lea.vmem %s104_s21, 16  ;;  %s845_s15 = scalar_lea.vmem %s104_s21, 32 }
  0x41   :  { %p842_p13 = scmp.ne.s32.totalorder %s104_s21, %s841_s5  ;;  %p846_p0 = scmp.lt.s32.totalorder %s104_s21, %s104_s21 }
  0x42   :  { %p847_p1 = scmp.lt.s32.totalorder %s845_s15, %s841_s5 }
  0x44   :  { %p848_p2 = por %p847_p1, %p846_p0 }
  0x46   :  { %p849_p3 = pnand %p848_p2, %p842_p13 }
  0x48   :  { %852 = shalt.err (!%p849_p3)
}
  0x49   :  { %106 = dma.hbm_to_vmem [thread:$0]  %s1309_s7, 16, %s104_s21, [#allocation15]  }
  0x4a   :  { %s853_s19 = scalar_lea.hbm %s1311_s9, 1024 }
  0x4b   :  { %p854_p4 = scmp.ne.s32.totalorder %s1311_s9, %s853_s19  ;;  %p857_p5 = scmp.lt.u32.totalorder %s853_s19, %s1311_s9 }
  0x4d   :  { %p859_p6 = pnand %p857_p5, %p854_p4 }
  0x4f   :  { %862 = shalt.err (!%p859_p6)
}
  0x50   :  { %s863_s1 = scalar_lea.vmem %s123_s23, 1024  ;;  %p868_p8 = scmp.lt.s32.totalorder %s123_s23, %s123_s23 }
  0x51   :  { %p864_p7 = scmp.ne.s32.totalorder %s123_s23, %s863_s1  ;;  %p869_p9 = scmp.lt.s32.totalorder %s863_s1, %s863_s1 }
  0x53   :  { %p870_p10 = por %p869_p9, %p868_p8 }
  0x55   :  { %p871_p11 = pnand %p870_p10, %p864_p7 }
  0x57   :  { %874 = shalt.err (!%p871_p11)
}
  0x58   :  { %128 = dma.hbm_to_vmem [thread:$0]  %s1311_s9, 1024, %s123_s23, [#allocation18], %s1044_s27, %s1044_s27, %s1045_s28  }
  0x59   :  { %s1050_s18 = smov [#allocation2]   ;;  %s1051_s25 = smov [#allocation7]  }
  0x5a   :  { %s29_s24 = sshll.u32 %s1050_s18, 4  ;;  %s51_s26 = sshll.u32 %s1051_s25, 4  ;;  %s30_s24 = int_to_ptr.vmem [resolvable:$true] %s29_s24  ;;  %s52_s26 = int_to_ptr.vmem [resolvable:$true] %s51_s26 }
  0x5b   :  { %s875_s5 = scalar_lea.hbm %s1302_s0, 64 }
  0x5c   :  { %p876_p12 = scmp.ne.s32.totalorder %s1302_s0, %s875_s5  ;;  %p879_p13 = scmp.lt.u32.totalorder %s875_s5, %s1302_s0 }
  0x5e   :  { %p881_p0 = pnand %p879_p13, %p876_p12 }
  0x60   :  { %884 = shalt.err (!%p881_p0)
}
  0x61   :  { %s885_s9 = scalar_lea.vmem %s30_s24, 64  ;;  %p890_p2 = scmp.lt.s32.totalorder %s30_s24, %s30_s24 }
  0x62   :  { %p886_p1 = scmp.ne.s32.totalorder %s30_s24, %s885_s9  ;;  %p891_p3 = scmp.lt.s32.totalorder %s885_s9, %s885_s9 }
  0x64   :  { %p892_p4 = por %p891_p3, %p890_p2 }
  0x66   :  { %p893_p5 = pnand %p892_p4, %p886_p1 }
  0x68   :  { %896 = shalt.err (!%p893_p5)
}
  0x69   :  { %32 = dma.hbm_to_vmem [thread:$0]  %s1302_s0, 64, %s30_s24, [#allocation3]  }
  0x6a   :  { %s897_s19 = scalar_lea.hbm %s1304_s2, 16 }
  0x6b   :  { %p898_p6 = scmp.ne.s32.totalorder %s1304_s2, %s897_s19  ;;  %p901_p7 = scmp.lt.u32.totalorder %s897_s19, %s1304_s2 }
  0x6d   :  { %p903_p8 = pnand %p901_p7, %p898_p6 }
  0x6f   :  { %906 = shalt.err (!%p903_p8)
}
  0x70   :  { %s907_s1 = scalar_lea.vmem %s52_s26, 16  ;;  %s911_s7 = scalar_lea.vmem %s52_s26, 32 }
  0x71   :  { %p908_p9 = scmp.ne.s32.totalorder %s52_s26, %s907_s1  ;;  %p912_p10 = scmp.lt.s32.totalorder %s52_s26, %s52_s26 }
  0x72   :  { %p913_p11 = scmp.lt.s32.totalorder %s911_s7, %s907_s1 }
  0x74   :  { %p914_p12 = por %p913_p11, %p912_p10 }
  0x76   :  { %p915_p13 = pnand %p914_p12, %p908_p9 }
  0x78   :  { %918 = shalt.err (!%p915_p13)
}
  0x79   :  { %54 = dma.hbm_to_vmem [thread:$0]  %s1304_s2, 16, %s52_s26, [#allocation6]  }
  0x7a   :  { %s1052_s18 = smov [#allocation10]   ;;  %s1053_s25 = smov [#allocation13]  }
  0x7b   :  { %s71_s24 = sshll.u32 %s1052_s18, 4  ;;  %s93_s29 = sshll.u32 %s1053_s25, 4  ;;  %s72_s24 = int_to_ptr.vmem [resolvable:$true] %s71_s24  ;;  %s94_s29 = int_to_ptr.vmem [resolvable:$true] %s93_s29 }
  0x7c   :  { %s919_s15 = scalar_lea.hbm %s1306_s4, 16 }
  0x7d   :  { %p920_p0 = scmp.ne.s32.totalorder %s1306_s4, %s919_s15  ;;  %p923_p1 = scmp.lt.u32.totalorder %s919_s15, %s1306_s4 }
  0x7f   :  { %p925_p2 = pnand %p923_p1, %p920_p0 }
  0x81   :  { %928 = shalt.err (!%p925_p2)
}
  0x82   :  { %s929_s2 = scalar_lea.vmem %s72_s24, 16  ;;  %s933_s26 = scalar_lea.vmem %s72_s24, 32 }
  0x83   :  { %p930_p3 = scmp.ne.s32.totalorder %s72_s24, %s929_s2  ;;  %p934_p4 = scmp.lt.s32.totalorder %s72_s24, %s72_s24 }
  0x84   :  { %p935_p5 = scmp.lt.s32.totalorder %s933_s26, %s929_s2 }
  0x86   :  { %p936_p6 = por %p935_p5, %p934_p4 }
  0x88   :  { %p937_p7 = pnand %p936_p6, %p930_p3 }
  0x8a   :  { %940 = shalt.err (!%p937_p7)
}
  0x8b   :  { %74 = dma.hbm_to_vmem [thread:$0]  %s1306_s4, 16, %s72_s24, [#allocation9]  }
  0x8c   :  { %s941_s19 = scalar_lea.hbm %s1308_s6, 16 }
  0x8d   :  { %p942_p8 = scmp.ne.s32.totalorder %s1308_s6, %s941_s19  ;;  %p945_p9 = scmp.lt.u32.totalorder %s941_s19, %s1308_s6 }
  0x8f   :  { %p947_p10 = pnand %p945_p9, %p942_p8 }
  0x91   :  { %950 = shalt.err (!%p947_p10)
}
  0x92   :  { %s951_s1 = scalar_lea.vmem %s94_s29, 16  ;;  %s955_s7 = scalar_lea.vmem %s94_s29, 32 }
  0x93   :  { %p952_p11 = scmp.ne.s32.totalorder %s94_s29, %s951_s1  ;;  %p956_p12 = scmp.lt.s32.totalorder %s94_s29, %s94_s29 }
  0x94   :  { %p957_p13 = scmp.lt.s32.totalorder %s955_s7, %s951_s1 }
  0x96   :  { %p958_p0 = por %p957_p13, %p956_p12 }
  0x98   :  { %p959_p1 = pnand %p958_p0, %p952_p11 }
  0x9a   :  { %962 = shalt.err (!%p959_p1)
}
  0x9b   :  { %96 = dma.hbm_to_vmem [thread:$0]  %s1308_s6, 16, %s94_s29, [#allocation12]  }
  0x9c   :  { %s1054_s21 = smov [#allocation16]   ;;  %s1055_s24 = smov [#allocation19]  }
  0x9d   :  { %s113_s18 = sshll.u32 %s1054_s21, 4  ;;  %s135_s25 = sshll.u32 %s1055_s24, 4  ;;  %s114_s18 = int_to_ptr.vmem [resolvable:$true] %s113_s18  ;;  %s136_s25 = int_to_ptr.vmem [resolvable:$true] %s135_s25 }
  0x9e   :  { %s963_s15 = scalar_lea.hbm %s1310_s8, 16 }
  0x9f   :  { %p964_p2 = scmp.ne.s32.totalorder %s1310_s8, %s963_s15  ;;  %p967_p3 = scmp.lt.u32.totalorder %s963_s15, %s1310_s8 }
  0xa1   :  { %p969_p4 = pnand %p967_p3, %p964_p2 }
  0xa3   :  { %972 = shalt.err (!%p969_p4)
}
  0xa4   :  { %s973_s6 = scalar_lea.vmem %s114_s18, 16  ;;  %s977_s29 = scalar_lea.vmem %s114_s18, 32 }
  0xa5   :  { %p974_p5 = scmp.ne.s32.totalorder %s114_s18, %s973_s6  ;;  %p978_p6 = scmp.lt.s32.totalorder %s114_s18, %s114_s18 }
  0xa6   :  { %p979_p7 = scmp.lt.s32.totalorder %s977_s29, %s973_s6 }
  0xa8   :  { %p980_p8 = por %p979_p7, %p978_p6 }
  0xaa   :  { %p981_p9 = pnand %p980_p8, %p974_p5 }
  0xac   :  { %984 = shalt.err (!%p981_p9)
}
  0xad   :  { %116 = dma.hbm_to_vmem [thread:$0]  %s1310_s8, 16, %s114_s18, [#allocation15]  }
  0xae   :  { %s985_s23 = scalar_lea.hbm %s1312_s10, 16 }
  0xaf   :  { %p986_p10 = scmp.ne.s32.totalorder %s1312_s10, %s985_s23  ;;  %p989_p11 = scmp.lt.u32.totalorder %s985_s23, %s1312_s10 }
  0xb1   :  { %p991_p12 = pnand %p989_p11, %p986_p10 }
  0xb3   :  { %994 = shalt.err (!%p991_p12)
}
  0xb4   :  { %s995_s20 = scalar_lea.vmem %s136_s25, 16  ;;  %s999_s22 = scalar_lea.vmem %s136_s25, 32 }
  0xb5   :  { %p996_p13 = scmp.ne.s32.totalorder %s136_s25, %s995_s20  ;;  %p1000_p0 = scmp.lt.s32.totalorder %s136_s25, %s136_s25 }
  0xb6   :  { %p1001_p1 = scmp.lt.s32.totalorder %s999_s22, %s995_s20 }
  0xb8   :  { %p1002_p2 = por %p1001_p1, %p1000_p0 }
  0xba   :  { %p1003_p3 = pnand %p1002_p2, %p996_p13 }
  0xbc   :  { %1006 = shalt.err (!%p1003_p3)
}
  0xbd   :  { %138 = dma.hbm_to_vmem [thread:$0]  %s1312_s10, 16, %s136_s25, [#allocation18]  }
  0xbe   :  { %1029 = dma.done.wait [#allocation3], 64  }
  0xbf   :  { %1030 = vsyncadd [#allocation3], 4294967232 }
  0xc0   :  { %1031 = dma.done.wait [#allocation6], 1040  }
  0xc1   :  { %1032 = vsyncadd [#allocation6], 4294966256 }
  0xc2   :  { %1033 = dma.done.wait [#allocation9], 32  }
  0xc3   :  { %1034 = vsyncadd [#allocation9], 4294967264 }
  0xc4   :  { %1035 = dma.done.wait [#allocation12], 1040  }
  0xc5   :  { %1036 = vsyncadd [#allocation12], 4294966256 }
  0xc6   :  { %1037 = dma.done.wait [#allocation15], 32  }
  0xc7   :  { %1038 = vsyncadd [#allocation15], 4294967264 }
  0xc8   :  { %1039 = dma.done.wait [#allocation18], 1040  }
  0xc9   :  { %1040 = vsyncadd [#allocation18], 4294966256  ;;  %v1056_v0 = vmov 0.0   ;;  %vm1057_vm0 = vmmov 0   ;;  %v737_v1 = vld [vmem:[#allocation5] sm:$0xff]   ;;  %v738_v2 = vld [vmem:[#allocation5 + $0x8] sm:$0xff]  }
  0xca   :  { %661 = vmatprep.subr.bf16.mxu0 %v1056_v0  ;;  %677 = vmatprep.mubr.msk.bf16.mxu0 %vm1057_vm0, %v1056_v0  ;;  %v739_v3 = vld [vmem:[#allocation5 + $0x10] sm:$0xff]   ;;  %v740_v4 = vld [vmem:[#allocation5 + $0x18] sm:$0xff]   ;;  %v741_v5 = vld [vmem:[#allocation5 + $0x20] sm:$0xff]   ;;  %s1058_s10 = smov [#allocation20]  }
  0xcb   :  { %681 = vmatprep.subr.bf16.mxu1 %v1056_v0  ;;  %697 = vmatprep.mubr.msk.bf16.mxu1 %vm1057_vm0, %v1056_v0  ;;  %v742_v6 = vld [vmem:[#allocation5 + $0x28] sm:$0xff]   ;;  %v743_v7 = vld [vmem:[#allocation5 + $0x30] sm:$0xff]   ;;  %v744_v8 = vld [vmem:[#allocation5 + $0x38] sm:$0xff]   ;;  %s589_s7 = sshll.u32 %s1058_s10, 4  ;;  %s590_s7 = int_to_ptr.vmem [resolvable:$true] %s589_s7 }
  0xcc   :  { %662 = vmatpush3.bf16.msra.mxu0 %v737_v1  ;;  %v173_v9 = vld [vmem:[#allocation2] sm:$0xf]  ;;  %v745_v10 = vld [vmem:[#allocation11] sm:$0xff]   ;;  %v746_v11 = vld [vmem:[#allocation11 + $0x8] sm:$0xff]   ;;  %s1007_s4 = scalar_lea.vmem %s590_s7, 128  ;;  %p1012_p5 = scmp.lt.s32.totalorder %s590_s7, %s590_s7 }
  0xcd   :  { %663 = vmatprep.subr.bf16.mxu0 %v1056_v0  ;;  %682 = vmatpush3.bf16.msra.mxu1 %v745_v10  ;;  %v747_v12 = vld [vmem:[#allocation11 + $0x10] sm:$0xff]   ;;  %v748_v13 = vld [vmem:[#allocation11 + $0x18] sm:$0xff]   ;;  %v749_v14 = vld [vmem:[#allocation11 + $0x20] sm:$0xff]   ;;  %p1008_p4 = scmp.ne.s32.totalorder %s590_s7, %s1007_s4  ;;  %p1013_p6 = scmp.lt.s32.totalorder %s1007_s4, %s1007_s4 }
  0xce   :  { %683 = vmatprep.subr.bf16.mxu1 %v1056_v0  ;;  %v750_v15 = vld [vmem:[#allocation11 + $0x28] sm:$0xff]   ;;  %v751_v16 = vld [vmem:[#allocation11 + $0x30] sm:$0xff]   ;;  %v752_v17 = vld [vmem:[#allocation11 + $0x38] sm:$0xff]  }
  0xcf   :  { %v603_v18 = vld [vmem:[#allocation7] ss:$0 sm:$0xff]  ;;  %v612_v42 = vld [vmem:[#allocation8] ss:$0 sm:$0xff]  ;;  %v613_v44 = vld [vmem:[#allocation10] ss:$0 sm:$0xff]  ;;  %p1014_p7 = por %p1013_p6, %p1012_p5 }
  0xd0   :  { %664 = vmatpush3.bf16.msra.mxu0 %v738_v2  ;;  %v753_v49 = vld [vmem:[#allocation17] sm:$0xff]   ;;  %v754_v50 = vld [vmem:[#allocation17 + $0x8] sm:$0xff]   ;;  %v755_v51 = vld [vmem:[#allocation17 + $0x10] sm:$0xff]  }
  0xd1   :  { %665 = vmatprep.subr.bf16.mxu0 %v1056_v0  ;;  %684 = vmatpush3.bf16.msra.mxu1 %v746_v11  ;;  %v756_v52 = vld [vmem:[#allocation17 + $0x18] sm:$0xff]   ;;  %v757_v53 = vld [vmem:[#allocation17 + $0x20] sm:$0xff]   ;;  %v758_v54 = vld [vmem:[#allocation17 + $0x28] sm:$0xff]   ;;  %p1015_p8 = pnand %p1014_p7, %p1008_p4 }
  0xd2   :  { %685 = vmatprep.subr.bf16.mxu1 %v1056_v0  ;;  %v759_v55 = vld [vmem:[#allocation17 + $0x30] sm:$0xff]   ;;  %v760_v56 = vld [vmem:[#allocation17 + $0x38] sm:$0xff]  }
  0xd3   :  { %v614_v57 = vld [vmem:[#allocation13] ss:$0 sm:$0xff] }
  0xd4   :  { %666 = vmatpush3.bf16.msra.mxu0 %v739_v3 }
  0xd5   :  { %667 = vmatprep.subr.bf16.mxu0 %v1056_v0  ;;  %686 = vmatpush3.bf16.msra.mxu1 %v747_v12 }
  0xd6   :  { %687 = vmatprep.subr.bf16.mxu1 %v1056_v0 }
  0xd8   :  { %668 = vmatpush3.bf16.msra.mxu0 %v740_v4 }
  0xd9   :  { %669 = vmatprep.subr.bf16.mxu0 %v1056_v0  ;;  %688 = vmatpush3.bf16.msra.mxu1 %v748_v13 }
  0xda   :  { %689 = vmatprep.subr.bf16.mxu1 %v1056_v0 }
  0xdc   :  { %670 = vmatpush3.bf16.msra.mxu0 %v741_v5 }
  0xdd   :  { %671 = vmatprep.subr.bf16.mxu0 %v1056_v0  ;;  %690 = vmatpush3.bf16.msra.mxu1 %v749_v14 }
  0xde   :  { %691 = vmatprep.subr.bf16.mxu1 %v1056_v0 }
  0xe0   :  { %672 = vmatpush3.bf16.msra.mxu0 %v742_v6 }
  0xe1   :  { %673 = vmatprep.subr.bf16.mxu0 %v1056_v0  ;;  %692 = vmatpush3.bf16.msra.mxu1 %v750_v15 }
  0xe2   :  { %693 = vmatprep.subr.bf16.mxu1 %v1056_v0 }
  0xe4   :  { %674 = vmatpush3.bf16.msra.mxu0 %v743_v7 }
  0xe5   :  { %675 = vmatprep.subr.bf16.mxu0 %v1056_v0  ;;  %694 = vmatpush3.bf16.msra.mxu1 %v751_v16 }
  0xe6   :  { %695 = vmatprep.subr.bf16.mxu1 %v1056_v0 }
  0xe8   :  { %676 = vmatpush3.bf16.msra.mxu0 %v744_v8 }
  0xe9   :  { %701 = vmatprep.subr.bf16.mxu0 %v1056_v0  ;;  %696 = vmatpush3.bf16.msra.mxu1 %v752_v17  ;;  %v623_v17 = vld [vmem:[#allocation14] ss:$0 sm:$0xff] }
  0xeb   :  { %678 = vmatmul.mubr.bf16.vlgmr.msra.gmra.mrb[0].mxu0 %v173_v9 }
  0xec   :  { %717 = vmatprep.mubr.msk.bf16.mxu0 %vm1057_vm0, %v1056_v0  ;;  %702 = vmatpush3.bf16.msra.mxu0 %v753_v49 }
  0xed   :  { %703 = vmatprep.subr.bf16.mxu0 %v1056_v0 }
  0xf0   :  { %704 = vmatpush3.bf16.msra.mxu0 %v754_v50 }
  0xf1   :  { %705 = vmatprep.subr.bf16.mxu0 %v1056_v0 }
  0xf4   :  { %706 = vmatpush3.bf16.msra.mxu0 %v755_v51 }
  0xf5   :  { %707 = vmatprep.subr.bf16.mxu0 %v1056_v0 }
  0xf8   :  { %708 = vmatpush3.bf16.msra.mxu0 %v756_v52 }
  0xf9   :  { %709 = vmatprep.subr.bf16.mxu0 %v1056_v0 }
  0xfc   :  { %710 = vmatpush3.bf16.msra.mxu0 %v757_v53 }
  0xfd   :  { %711 = vmatprep.subr.bf16.mxu0 %v1056_v0 }
 0x100   :  { %712 = vmatpush3.bf16.msra.mxu0 %v758_v54 }
 0x101   :  { %713 = vmatprep.subr.bf16.mxu0 %v1056_v0 }
 0x104   :  { %714 = vmatpush3.bf16.msra.mxu0 %v759_v55 }
 0x105   :  { %715 = vmatprep.subr.bf16.mxu0 %v1056_v0 }
 0x108   :  { %716 = vmatpush3.bf16.msra.mxu0 %v760_v56 }
 0x1be   :  { %v279_v19 = vpop.f32.mrb[0].mxu0 }
 0x1bf   :  { %v280_v20 = vadd.f32 %v603_v18, %v279_v19  ;;  %v679_v21 = vpop.f32.mrb[1].mxu0  ;;  %v624_v19 = vld [vmem:[#allocation16] ss:$0 sm:$0xff] }
 0x1c0   :  { %v282_v22 = vpop.f32.mrb[2].mxu0 }
 0x1c1   :  { %v285_v23 = vrot.slane %v280_v20, 4  ;;  %v680_v24 = vpop.f32.mrb[3].mxu0 }
 0x1c2   :  { %v625_v24 = vld [vmem:[#allocation19] ss:$0 sm:$0xff] }
 0x1c3   :  { %v286_v25 = vadd.f32 %v285_v23, %v280_v20 }
 0x1c5   :  { %v287_v26 = vrot.slane %v286_v25, 2 }
 0x1c7   :  { %v288_v27 = vadd.f32 %v287_v26, %v286_v25 }
 0x1c9   :  { %v289_v28 = vrot.slane %v288_v27, 1 }
 0x1cb   :  { %v290_v29 = vadd.f32 %v289_v28, %v288_v27 }
 0x1cd   :  { %v292_v30 = vmul.f32 0.125, %v290_v29 }
 0x1cf   :  { %v293_v31 = vsub.f32 %v280_v20, %v292_v30 }
 0x1d1   :  { %v294_v32 = vmul.f32 %v293_v31, %v293_v31 }
 0x1d3   :  { %v295_v33 = vrot.slane %v294_v32, 4 }
 0x1d5   :  { %v296_v34 = vadd.f32 %v295_v33, %v294_v32 }
 0x1d7   :  { %v297_v35 = vrot.slane %v296_v34, 2 }
 0x1d9   :  { %v298_v36 = vadd.f32 %v297_v35, %v296_v34 }
 0x1db   :  { %v299_v37 = vrot.slane %v298_v36, 1 }
 0x1dd   :  { %v300_v38 = vadd.f32 %v299_v37, %v298_v36 }
 0x1df   :  { %v301_v39 = vmul.f32 0.125, %v300_v38 }
 0x1e1   :  { %v302_v40 = vadd.f32 1e-05, %v301_v39 }
 0x1e3   :  { %761 = vrsqrt.f32 %v302_v40 }
 0x1ed   :  { %v762_v41 = vpop.eup %761 }
 0x1ee   :  { %v304_v43 = vmul.f32 %v762_v41, %v293_v31 }
 0x1f0   :  { %v312_v45 = vmul.f32 %v612_v42, %v304_v43 }
 0x1f2   :  { %v320_v46 = vadd.f32 %v613_v44, %v312_v45 }
 0x1f4   :  { %v321_v47 = vmax.f32 %v320_v46, 0.0 }
 0x1f6   :  { %v322_v48 = vpack.c.bf16 %v321_v47, %v321_v47 }
 0x1f8   :  { %698 = vmatmul.mubr.bf16.vlgmr.msra.gmra.mrb[0].mxu1 %v322_v48 }
 0x2cb   :  { %v428_v58 = vpop.f32.mrb[0].mxu1 }
 0x2cc   :  { %v429_v59 = vadd.f32 %v614_v57, %v428_v58  ;;  %v699_v60 = vpop.f32.mrb[1].mxu1 }
 0x2cd   :  { %v431_v61 = vpop.f32.mrb[2].mxu1 }
 0x2ce   :  { %v434_v62 = vrot.slane %v429_v59, 4  ;;  %v700_v63 = vpop.f32.mrb[3].mxu1 }
 0x2d0   :  { %v435_v1 = vadd.f32 %v434_v62, %v429_v59 }
 0x2d2   :  { %v436_v2 = vrot.slane %v435_v1, 2 }
 0x2d4   :  { %v437_v3 = vadd.f32 %v436_v2, %v435_v1 }
 0x2d6   :  { %v438_v4 = vrot.slane %v437_v3, 1 }
 0x2d8   :  { %v439_v5 = vadd.f32 %v438_v4, %v437_v3 }
 0x2da   :  { %v440_v6 = vmul.f32 0.125, %v439_v5 }
 0x2dc   :  { %v441_v7 = vsub.f32 %v429_v59, %v440_v6 }
 0x2de   :  { %v442_v8 = vmul.f32 %v441_v7, %v441_v7 }
 0x2e0   :  { %v443_v9 = vrot.slane %v442_v8, 4 }
 0x2e2   :  { %v444_v10 = vadd.f32 %v443_v9, %v442_v8 }
 0x2e4   :  { %v445_v11 = vrot.slane %v444_v10, 2 }
 0x2e6   :  { %v446_v0 = vadd.f32 %v445_v11, %v444_v10 }
 0x2e8   :  { %v447_v12 = vrot.slane %v446_v0, 1 }
 0x2ea   :  { %v448_v13 = vadd.f32 %v447_v12, %v446_v0 }
 0x2ec   :  { %v449_v14 = vmul.f32 0.125, %v448_v13 }
 0x2ee   :  { %v450_v15 = vadd.f32 1e-05, %v449_v14 }
 0x2f0   :  { %763 = vrsqrt.f32 %v450_v15 }
 0x2fa   :  { %v764_v16 = vpop.eup %763 }
 0x2fb   :  { %v452_v18 = vmul.f32 %v764_v16, %v441_v7 }
 0x2fd   :  { %v460_v20 = vmul.f32 %v623_v17, %v452_v18 }
 0x2ff   :  { %v468_v21 = vadd.f32 %v624_v19, %v460_v20 }
 0x301   :  { %v469_v22 = vmax.f32 %v468_v21, 0.0 }
 0x303   :  { %v470_v23 = vpack.c.bf16 %v469_v22, %v469_v22 }
 0x305   :  { %718 = vmatmul.mubr.bf16.vlgmr.msra.gmra.mrb[4].mxu0 %v470_v23 }
 0x3d8   :  { %v576_v25 = vpop.f32.mrb[4].mxu0 }
 0x3d9   :  { %v577_v26 = vadd.f32 %v625_v24, %v576_v25  ;;  %v719_v27 = vpop.f32.mrb[5].mxu0 }
 0x3da   :  { %v579_v28 = vpop.f32.mrb[6].mxu0 }
 0x3db   :  { %582 = vst [vmem:[#allocation20] sm:$0xff] %v577_v26  ;;  %v720_v29 = vpop.f32.mrb[7].mxu0 }
 0x3dc   :  { %1018 = shalt.err (!%p1015_p8)
}
 0x3dd   :  { %s1019_s18 = scalar_lea.hbm %s1313_s11, 128 }
 0x3de   :  { %p1020_p9 = scmp.ne.s32.totalorder %s1313_s11, %s1019_s18  ;;  %p1023_p10 = scmp.lt.u32.totalorder %s1019_s18, %s1313_s11 }
 0x3e0   :  { %p1025_p11 = pnand %p1023_p10, %p1020_p9 }
 0x3e2   :  { %1028 = shalt.err (!%p1025_p11)
}
 0x3e3   :  { %592 = dma.vmem_to_hbm [thread:$0]  %s590_s7, 128, %s1313_s11, [#allocation4]  }
 0x3e4   :  { %1041 = dma.done.wait [#allocation4], 128  }
 0x3e5   :  { %1042 = vsyncadd [#allocation4], 4294967168 }
 0x3e6   :  { %596 = vsyncpa [#allocation3], 1 }
 0x3e7   :  { %597 = vsyncpa [#allocation6], 1 }
 0x3e8   :  { %598 = vsyncpa [#allocation9], 1 }
 0x3e9   :  { %599 = vsyncpa [#allocation12], 1 }
 0x3ea   :  { %600 = vsyncpa [#allocation15], 1 }
 0x3eb   :  { %601 = vsyncpa [#allocation18], 1 }
 0x3ec   :  { %602 = vsyncpa [#allocation4], 1 }

</bundles_post_ra>
